<compile_context>
chip_gen: v5e
topology: v5e:2x2
jax: 0.10.0
libtpu: 0.0.40
codegen_flags: <defaults>
</compile_context>

<pallas_src>
import functools
import math

import jax
import jax.numpy as jnp
from jax.experimental import pallas as pl
from jax.experimental.pallas import tpu as pltpu

_NEG = -1e30  # bias padding: exp(_NEG - max) underflows to exactly 0.0 in f32


# ----------------------------------------------------------------------------- kernel
def _attn_decoder_kernel(onehot_ref, h_ref, enc_ref,
                         we_ref, be_ref,
                         wa_ref, ba_ref,
                         wc_ref, bc_ref,
                         wg_ref, bg_ref,
                         wo_ref, bo_ref,
                         probs_ref, hnew_ref, attnw_ref):
    H = h_ref.shape[1]

    onehot = onehot_ref[...]
    h = h_ref[...]

    # embedding linear (input.float() @ W + b); dropout is identity in eval mode
    # TODO(synk): training-mode dropout (p=0.1) not implemented (inference path).
    emb = jnp.dot(onehot, we_ref[...], preferred_element_type=jnp.float32) + be_ref[...]

    # attention weights: softmax over the (128-padded) max_length axis
    eh = jnp.concatenate([emb, h], axis=1)                                   # (1, 2H)
    a_logits = jnp.dot(eh, wa_ref[...], preferred_element_type=jnp.float32) + ba_ref[...]
    a_m = jnp.max(a_logits, axis=-1, keepdims=True)
    a_e = jnp.exp(a_logits - a_m)                                            # pads -> 0
    attn_w = a_e / jnp.sum(a_e, axis=-1, keepdims=True)
    attnw_ref[...] = attn_w

    # attn_applied = bmm(attn_w, encoder_output)   (padded rows contribute 0)
    attn_applied = jnp.dot(attn_w, enc_ref[...], preferred_element_type=jnp.float32)

    # attn_combine + ReLU
    comb_in = jnp.concatenate([emb, attn_applied], axis=1)                   # (1, 2H)
    x = jnp.dot(comb_in, wc_ref[...], preferred_element_type=jnp.float32) + bc_ref[...]
    x = jnp.maximum(x, 0.0)

    # GRU step: single fused (1,2H)@(2H,4H) gate matmul,
    # column blocks: [ r_x+r_h | z_x+z_h | n_x | n_h ]  (biases fused likewise)
    xh = jnp.concatenate([x, h], axis=1)
    g = jnp.dot(xh, wg_ref[...], preferred_element_type=jnp.float32) + bg_ref[...]
    r = jax.nn.sigmoid(g[:, 0:H])
    z = jax.nn.sigmoid(g[:, H:2 * H])
    n = jnp.tanh(g[:, 2 * H:3 * H] + r * g[:, 3 * H:4 * H])
    h_new = (1.0 - z) * n + z * h
    hnew_ref[...] = h_new

    # output projection (padded to a lane-dense 128 slab) + softmax over classes
    logits = jnp.dot(h_new, wo_ref[...], preferred_element_type=jnp.float32) + bo_ref[...]
    o_m = jnp.max(logits, axis=-1, keepdims=True)
    o_e = jnp.exp(logits - o_m)                                              # pads -> 0
    probs_ref[...] = o_e / jnp.sum(o_e, axis=-1, keepdims=True)


# ----------------------------------------------------------------------------- wrapper
def _round_up(n, m):
    return ((n + m - 1) // m) * m


def target_transform(label, output_size):
    # PyTorch target_transform: one-hot row of size output_size (extra unsqueeze
    # is a pure reshape and is collapsed here).
    return jax.nn.one_hot(jnp.asarray(label), output_size, dtype=jnp.float32).reshape(
        1, output_size)


def prepare_params(p):
    """One-time: fuse GRU gate matmuls and pad lane dims to multiples of 128."""
    H = p["W_hh"].shape[0]
    L = p["W_attn"].shape[1]
    O = p["W_out"].shape[1]
    Lp = _round_up(L, 128)
    Op = _round_up(O, 128)

    zHH = jnp.zeros((H, H), jnp.float32)
    W_ih, W_hh = p["W_ih"], p["W_hh"]
    # fused GRU weight (2H, 4H): cols [r | z | n_x | n_h]
    W_gru = jnp.concatenate([
        jnp.concatenate([W_ih[:, 0:H], W_ih[:, H:2 * H], W_ih[:, 2 * H:3 * H], zHH], axis=1),
        jnp.concatenate([W_hh[:, 0:H], W_hh[:, H:2 * H], zHH, W_hh[:, 2 * H:3 * H]], axis=1),
    ], axis=0)
    b_gru = jnp.concatenate([
        p["b_ih"][:, 0:H] + p["b_hh"][:, 0:H],
        p["b_ih"][:, H:2 * H] + p["b_hh"][:, H:2 * H],
        p["b_ih"][:, 2 * H:3 * H],
        p["b_hh"][:, 2 * H:3 * H],
    ], axis=1)

    return {
        "W_emb": p["W_emb"], "b_emb": p["b_emb"],
        "W_attn": jnp.pad(p["W_attn"], ((0, 0), (0, Lp - L))),
        "b_attn": jnp.pad(p["b_attn"], ((0, 0), (0, Lp - L)), constant_values=_NEG),
        "W_comb": p["W_comb"], "b_comb": p["b_comb"],
        "W_gru": W_gru, "b_gru": b_gru,
        "W_out": jnp.pad(p["W_out"], ((0, 0), (0, Op - O))),
        "b_out": jnp.pad(p["b_out"], ((0, 0), (0, Op - O)), constant_values=_NEG),
    }


@functools.partial(jax.jit, static_argnames=("output_size",))
def attention_decoder_forward(label, hidden, encoder_output, prep, *, output_size):
    """label: scalar class index; hidden: (1,1,H); encoder_output: (max_length, H).
    Returns (probs (1,O), new_hidden (1,1,H), attn_weight (1,max_length))."""
    H = hidden.shape[-1]
    L = encoder_output.shape[0]
    Lp = prep["W_attn"].shape[1]
    Op = prep["W_out"].shape[1]

    onehot = target_transform(label, output_size)
    h2d = hidden.reshape(1, H)
    enc_p = jnp.pad(encoder_output.astype(jnp.float32), ((0, Lp - L), (0, 0)))

    vmem = pl.BlockSpec(memory_space=pltpu.MemorySpace.VMEM)

    probs_p, h_new, attnw_p = pl.pallas_call(
        _attn_decoder_kernel,
        out_shape=(
            jax.ShapeDtypeStruct((1, Op), jnp.float32),
            jax.ShapeDtypeStruct((1, H), jnp.float32),
            jax.ShapeDtypeStruct((1, Lp), jnp.float32),
        ),
        in_specs=[vmem] * 13,
        out_specs=(vmem, vmem, vmem),
        input_output_aliases={1: 1},   # reuse the hidden buffer for the new hidden
    )(
        onehot, h2d, enc_p,
        prep["W_emb"], prep["b_emb"],
        prep["W_attn"], prep["b_attn"],
        prep["W_comb"], prep["b_comb"],
        prep["W_gru"], prep["b_gru"],
        prep["W_out"], prep["b_out"],
    )
    return probs_p[:, :output_size], h_new.reshape(1, 1, H), attnw_p[:, :L]


# ----------------------------------------------------------------------------- init / reference
def init_params(key, hidden_size, output_size, max_length):
    """Deterministic init mimicking PyTorch default uniform(-1/sqrt(fan_in)).
    Weights stored as (in_features, out_features) so kernels compute x @ W + b."""
    H, O, L = hidden_size, output_size, max_length
    ks = jax.random.split(key, 12)

    def u(k, shape, fan_in):
        b = 1.0 / math.sqrt(fan_in)
        return jax.random.uniform(k, shape, jnp.float32, -b, b)

    return {
        "W_emb": u(ks[0], (O, H), O),            "b_emb": u(ks[1], (1, H), O),
        "W_attn": u(ks[2], (2 * H, L), 2 * H),   "b_attn": u(ks[3], (1, L), 2 * H),
        "W_comb": u(ks[4], (2 * H, H), 2 * H),   "b_comb": u(ks[5], (1, H), 2 * H),
        "W_ih": u(ks[6], (H, 3 * H), H),         "b_ih": u(ks[7], (1, 3 * H), H),
        "W_hh": u(ks[8], (H, 3 * H), H),         "b_hh": u(ks[9], (1, 3 * H), H),
        "W_out": u(ks[10], (H, O), H),           "b_out": u(ks[11], (1, O), H),
    }


def reference_forward(label, hidden, encoder_output, p, output_size):
    """Pure-JAX reference using the raw (unfused, unpadded) parameters."""
    H = p["W_hh"].shape[0]
    onehot = target_transform(label, output_size)
    h = hidden.reshape(1, H)
    emb = onehot @ p["W_emb"] + p["b_emb"]
    attn_w = jax.nn.softmax(jnp.concatenate([emb, h], 1) @ p["W_attn"] + p["b_attn"], axis=1)
    attn_applied = attn_w @ encoder_output
    x = jnp.maximum(jnp.concatenate([emb, attn_applied], 1) @ p["W_comb"] + p["b_comb"], 0.0)
    gi = x @ p["W_ih"] + p["b_ih"]
    gh = h @ p["W_hh"] + p["b_hh"]
    r = jax.nn.sigmoid(gi[:, :H] + gh[:, :H])
    z = jax.nn.sigmoid(gi[:, H:2 * H] + gh[:, H:2 * H])
    n = jnp.tanh(gi[:, 2 * H:] + r * gh[:, 2 * H:])
    h_new = (1.0 - z) * n + z * h
    probs = jax.nn.softmax(h_new @ p["W_out"] + p["b_out"], axis=1)
    return probs, h_new.reshape(1, 1, H), attn_w


# ----------------------------------------------------------------------------- main
if __name__ == "__main__":
    hidden_size = 128   # module default is 256; kept small but lane-aligned
    output_size = 2     # binary classes, as in the module
    max_length = 96     # module default MAX_LENGTH=865; small, exercises pad-to-128

    key = jax.random.PRNGKey(0)
    kp, ke = jax.random.split(key)
    params = init_params(kp, hidden_size, output_size, max_length)
    prep = prepare_params(params)

    label = 1                                              # class index (train_y)
    hidden = jnp.zeros((1, 1, hidden_size), jnp.float32)   # init_hidden()
    encoder_output = jax.random.normal(ke, (max_length, hidden_size), jnp.float32)

    probs, new_hidden, attn_w = attention_decoder_forward(
        label, hidden, encoder_output, prep, output_size=output_size)
    jax.block_until_ready((probs, new_hidden, attn_w))

    assert probs.shape == (1, output_size)
    assert new_hidden.shape == (1, 1, hidden_size)
    assert attn_w.shape == (1, max_length)

    # pure-JAX reference check (loose tolerance to allow MXU f32 precision modes)
    r_probs, r_hidden, r_attn = reference_forward(
        label, hidden, encoder_output, params, output_size)
    assert jnp.allclose(probs, r_probs, atol=1e-2, rtol=1e-2)
    assert jnp.allclose(new_hidden, r_hidden, atol=1e-2, rtol=1e-2)
    assert jnp.allclose(attn_w, r_attn, atol=1e-2, rtol=1e-2)

    print("KERNEL_OK")
</pallas_src>

<mosaic_0001>
module attributes {stable_mosaic.version = 11 : i64} {
  func.func @_attn_decoder_kernel(%arg0: memref<1x2xf32, #tpu.memory_space<vmem>>, %arg1: memref<1x128xf32, #tpu.memory_space<vmem>>, %arg2: memref<128x128xf32, #tpu.memory_space<vmem>>, %arg3: memref<2x128xf32, #tpu.memory_space<vmem>>, %arg4: memref<1x128xf32, #tpu.memory_space<vmem>>, %arg5: memref<256x128xf32, #tpu.memory_space<vmem>>, %arg6: memref<1x128xf32, #tpu.memory_space<vmem>>, %arg7: memref<256x128xf32, #tpu.memory_space<vmem>>, %arg8: memref<1x128xf32, #tpu.memory_space<vmem>>, %arg9: memref<256x512xf32, #tpu.memory_space<vmem>>, %arg10: memref<1x512xf32, #tpu.memory_space<vmem>>, %arg11: memref<128x128xf32, #tpu.memory_space<vmem>>, %arg12: memref<1x128xf32, #tpu.memory_space<vmem>>, %arg13: memref<1x128xf32, #tpu.memory_space<vmem>>, %arg14: memref<1x128xf32, #tpu.memory_space<vmem>>, %arg15: memref<1x128xf32, #tpu.memory_space<vmem>>) attributes {dimension_semantics = [], scalar_prefetch = 0 : i64, scratch_operands = 0 : i64, tpu.core_type = #tpu.core_type<tc>} {
    %c0 = arith.constant 0 : index
    %c0_0 = arith.constant 0 : index
    %0 = vector.load %arg0[%c0, %c0_0] : memref<1x2xf32, #tpu.memory_space<vmem>>, vector<1x2xf32>
    %c0_1 = arith.constant 0 : index
    %c0_2 = arith.constant 0 : index
    %1 = vector.load %arg1[%c0_1, %c0_2] : memref<1x128xf32, #tpu.memory_space<vmem>>, vector<1x128xf32>
    %c0_3 = arith.constant 0 : index
    %c0_4 = arith.constant 0 : index
    %2 = vector.load %arg3[%c0_3, %c0_4] : memref<2x128xf32, #tpu.memory_space<vmem>>, vector<2x128xf32>
    %cst = arith.constant dense<0.000000e+00> : vector<1x128xf32>
    %3 = tpu.matmul %0, %2, %cst {dimension_numbers = #tpu.dot_dimension_numbers<[1], [0], [0], [1], [0, 0, 1, 1], [], []>} : vector<1x2xf32>, vector<2x128xf32>, vector<1x128xf32> -> vector<1x128xf32>
    %c0_5 = arith.constant 0 : index
    %c0_6 = arith.constant 0 : index
    %4 = vector.load %arg4[%c0_5, %c0_6] : memref<1x128xf32, #tpu.memory_space<vmem>>, vector<1x128xf32>
    %5 = arith.addf %3, %4 : vector<1x128xf32>
    %6 = tpu.concatenate %5, %1 in 1 : vector<1x128xf32>, vector<1x128xf32> -> vector<1x256xf32>
    %c0_7 = arith.constant 0 : index
    %c0_8 = arith.constant 0 : index
    %7 = vector.load %arg5[%c0_7, %c0_8] : memref<256x128xf32, #tpu.memory_space<vmem>>, vector<256x128xf32>
    %cst_9 = arith.constant dense<0.000000e+00> : vector<1x128xf32>
    %8 = tpu.matmul %6, %7, %cst_9 {dimension_numbers = #tpu.dot_dimension_numbers<[1], [0], [0], [1], [0, 0, 1, 1], [], []>} : vector<1x256xf32>, vector<256x128xf32>, vector<1x128xf32> -> vector<1x128xf32>
    %c0_10 = arith.constant 0 : index
    %c0_11 = arith.constant 0 : index
    %9 = vector.load %arg6[%c0_10, %c0_11] : memref<1x128xf32, #tpu.memory_space<vmem>>, vector<1x128xf32>
    %10 = arith.addf %8, %9 : vector<1x128xf32>
    %cst_12 = arith.constant dense<0xFF800000> : vector<1xf32>
    %11 = vector.multi_reduction <maximumf>, %10, %cst_12 [1] : vector<1x128xf32> to vector<1xf32>
    %12 = vector.shape_cast %11 : vector<1xf32> to vector<1x1xf32>
    %13 = vector.broadcast %12 : vector<1x1xf32> to vector<1x128xf32>
    %14 = arith.subf %10, %13 : vector<1x128xf32>
    %15 = math.exp %14 : vector<1x128xf32>
    %cst_13 = arith.constant dense<0.000000e+00> : vector<1xf32>
    %16 = vector.multi_reduction <add>, %15, %cst_13 [1] : vector<1x128xf32> to vector<1xf32>
    %17 = vector.shape_cast %16 : vector<1xf32> to vector<1x1xf32>
    %18 = vector.broadcast %17 : vector<1x1xf32> to vector<1x128xf32>
    %19 = arith.divf %15, %18 : vector<1x128xf32>
    %c0_14 = arith.constant 0 : index
    %c0_15 = arith.constant 0 : index
    %20 = vector.load %arg15[%c0_14, %c0_15] : memref<1x128xf32, #tpu.memory_space<vmem>>, vector<1x128xf32>
    tpu.vector_store %arg15[%c0_14, %c0_15], %19 {strides = array<i32>} : memref<1x128xf32, #tpu.memory_space<vmem>>, vector<1x128xf32>,
    %c0_16 = arith.constant 0 : index
    %c0_17 = arith.constant 0 : index
    %21 = vector.load %arg2[%c0_16, %c0_17] : memref<128x128xf32, #tpu.memory_space<vmem>>, vector<128x128xf32>
    %cst_18 = arith.constant dense<0.000000e+00> : vector<1x128xf32>
    %22 = tpu.matmul %19, %21, %cst_18 {dimension_numbers = #tpu.dot_dimension_numbers<[1], [0], [0], [1], [0, 0, 1, 1], [], []>} : vector<1x128xf32>, vector<128x128xf32>, vector<1x128xf32> -> vector<1x128xf32>
    %23 = tpu.concatenate %5, %22 in 1 : vector<1x128xf32>, vector<1x128xf32> -> vector<1x256xf32>
    %c0_19 = arith.constant 0 : index
    %c0_20 = arith.constant 0 : index
    %24 = vector.load %arg7[%c0_19, %c0_20] : memref<256x128xf32, #tpu.memory_space<vmem>>, vector<256x128xf32>
    %cst_21 = arith.constant dense<0.000000e+00> : vector<1x128xf32>
    %25 = tpu.matmul %23, %24, %cst_21 {dimension_numbers = #tpu.dot_dimension_numbers<[1], [0], [0], [1], [0, 0, 1, 1], [], []>} : vector<1x256xf32>, vector<256x128xf32>, vector<1x128xf32> -> vector<1x128xf32>
    %c0_22 = arith.constant 0 : index
    %c0_23 = arith.constant 0 : index
    %26 = vector.load %arg8[%c0_22, %c0_23] : memref<1x128xf32, #tpu.memory_space<vmem>>, vector<1x128xf32>
    %27 = arith.addf %25, %26 : vector<1x128xf32>
    %cst_24 = arith.constant 0.000000e+00 : f32
    %28 = vector.broadcast %cst_24 : f32 to vector<1x128xf32>
    %29 = arith.maximumf %27, %28 : vector<1x128xf32>
    %30 = tpu.concatenate %29, %1 in 1 : vector<1x128xf32>, vector<1x128xf32> -> vector<1x256xf32>
    %c0_25 = arith.constant 0 : index
    %c0_26 = arith.constant 0 : index
    %31 = vector.load %arg9[%c0_25, %c0_26] : memref<256x512xf32, #tpu.memory_space<vmem>>, vector<256x512xf32>
    %cst_27 = arith.constant dense<0.000000e+00> : vector<1x512xf32>
    %32 = tpu.matmul %30, %31, %cst_27 {dimension_numbers = #tpu.dot_dimension_numbers<[1], [0], [0], [1], [0, 0, 1, 1], [], []>} : vector<1x256xf32>, vector<256x512xf32>, vector<1x512xf32> -> vector<1x512xf32>
    %c0_28 = arith.constant 0 : index
    %c0_29 = arith.constant 0 : index
    %33 = vector.load %arg10[%c0_28, %c0_29] : memref<1x512xf32, #tpu.memory_space<vmem>>, vector<1x512xf32>
    %34 = arith.addf %32, %33 : vector<1x512xf32>
    %35 = vector.extract_strided_slice %34 {offsets = [0, 0], sizes = [1, 128], strides = [1, 1]} : vector<1x512xf32> to vector<1x128xf32>
    %36 = arith.negf %35 : vector<1x128xf32>
    %37 = math.exp %36 : vector<1x128xf32>
    %cst_30 = arith.constant 1.000000e+00 : f32
    %38 = vector.broadcast %cst_30 : f32 to vector<1x128xf32>
    %39 = arith.addf %38, %37 : vector<1x128xf32>
    %40 = arith.divf %38, %39 : vector<1x128xf32>
    %41 = vector.extract_strided_slice %34 {offsets = [0, 128], sizes = [1, 128], strides = [1, 1]} : vector<1x512xf32> to vector<1x128xf32>
    %42 = arith.negf %41 : vector<1x128xf32>
    %43 = math.exp %42 : vector<1x128xf32>
    %cst_31 = arith.constant 1.000000e+00 : f32
    %44 = vector.broadcast %cst_31 : f32 to vector<1x128xf32>
    %45 = arith.addf %44, %43 : vector<1x128xf32>
    %46 = arith.divf %44, %45 : vector<1x128xf32>
    %47 = vector.extract_strided_slice %34 {offsets = [0, 256], sizes = [1, 128], strides = [1, 1]} : vector<1x512xf32> to vector<1x128xf32>
    %48 = vector.extract_strided_slice %34 {offsets = [0, 384], sizes = [1, 128], strides = [1, 1]} : vector<1x512xf32> to vector<1x128xf32>
    %49 = arith.mulf %40, %48 : vector<1x128xf32>
    %50 = arith.addf %47, %49 : vector<1x128xf32>
    %51 = math.tanh %50 : vector<1x128xf32>
    %cst_32 = arith.constant 1.000000e+00 : f32
    %52 = vector.broadcast %cst_32 : f32 to vector<1x128xf32>
    %53 = arith.subf %52, %46 : vector<1x128xf32>
    %54 = arith.mulf %53, %51 : vector<1x128xf32>
    %55 = arith.mulf %46, %1 : vector<1x128xf32>
    %56 = arith.addf %54, %55 : vector<1x128xf32>
    %c0_33 = arith.constant 0 : index
    %c0_34 = arith.constant 0 : index
    %57 = vector.load %arg14[%c0_33, %c0_34] : memref<1x128xf32, #tpu.memory_space<vmem>>, vector<1x128xf32>
    tpu.vector_store %arg14[%c0_33, %c0_34], %56 {strides = array<i32>} : memref<1x128xf32, #tpu.memory_space<vmem>>, vector<1x128xf32>,
    %c0_35 = arith.constant 0 : index
    %c0_36 = arith.constant 0 : index
    %58 = vector.load %arg11[%c0_35, %c0_36] : memref<128x128xf32, #tpu.memory_space<vmem>>, vector<128x128xf32>
    %cst_37 = arith.constant dense<0.000000e+00> : vector<1x128xf32>
    %59 = tpu.matmul %56, %58, %cst_37 {dimension_numbers = #tpu.dot_dimension_numbers<[1], [0], [0], [1], [0, 0, 1, 1], [], []>} : vector<1x128xf32>, vector<128x128xf32>, vector<1x128xf32> -> vector<1x128xf32>
    %c0_38 = arith.constant 0 : index
    %c0_39 = arith.constant 0 : index
    %60 = vector.load %arg12[%c0_38, %c0_39] : memref<1x128xf32, #tpu.memory_space<vmem>>, vector<1x128xf32>
    %61 = arith.addf %59, %60 : vector<1x128xf32>
    %cst_40 = arith.constant dense<0xFF800000> : vector<1xf32>
    %62 = vector.multi_reduction <maximumf>, %61, %cst_40 [1] : vector<1x128xf32> to vector<1xf32>
    %63 = vector.shape_cast %62 : vector<1xf32> to vector<1x1xf32>
    %64 = vector.broadcast %63 : vector<1x1xf32> to vector<1x128xf32>
    %65 = arith.subf %61, %64 : vector<1x128xf32>
    %66 = math.exp %65 : vector<1x128xf32>
    %cst_41 = arith.constant dense<0.000000e+00> : vector<1xf32>
    %67 = vector.multi_reduction <add>, %66, %cst_41 [1] : vector<1x128xf32> to vector<1xf32>
    %68 = vector.shape_cast %67 : vector<1xf32> to vector<1x1xf32>
    %69 = vector.broadcast %68 : vector<1x1xf32> to vector<1x128xf32>
    %70 = arith.divf %66, %69 : vector<1x128xf32>
    %c0_42 = arith.constant 0 : index
    %c0_43 = arith.constant 0 : index
    %71 = vector.load %arg13[%c0_42, %c0_43] : memref<1x128xf32, #tpu.memory_space<vmem>>, vector<1x128xf32>
    tpu.vector_store %arg13[%c0_42, %c0_43], %70 {strides = array<i32>} : memref<1x128xf32, #tpu.memory_space<vmem>>, vector<1x128xf32>,
    return
  }
}

</mosaic_0001>

<bundles_post_ra>
// kernel: attention_decoder_forward.1
= control target key start
LH: loop header
LB: loop body
LE: loop exit
PB: predicated region body
PF: predicated region fallthrough
CT: control target
= control target key end

     0   :  { %21 = vsyncpa [#allocation3], 0  ;;  %s1189_s0 = inlined_call_operand.vmem [shape: f32[1,2], index: 0, kind: input, shape index: {}]   ;;  %s1190_s1 = inlined_call_operand.vmem [shape: f32[1,128], index: 1, kind: input, shape index: {}, may-alias: {1,14}]   ;;  %s1191_s2 = inlined_call_operand.vmem [shape: f32[128,128], index: 2, kind: input, shape index: {}]   ;;  %s1192_s3 = inlined_call_operand.vmem [shape: f32[2,128], index: 3, kind: input, shape index: {}]   ;;  %s1193_s4 = inlined_call_operand.vmem [shape: f32[1,128], index: 4, kind: input, shape index: {}]   ;;  %s1194_s5 = inlined_call_operand.hbm [shape: f32[256,128], index: 5, kind: input, shape index: {}]   ;;  %s1195_s6 = inlined_call_operand.vmem [shape: f32[1,128], index: 6, kind: input, shape index: {}]   ;;  %s1196_s7 = inlined_call_operand.hbm [shape: f32[256,128], index: 7, kind: input, shape index: {}]   ;;  %s1197_s8 = inlined_call_operand.vmem [shape: f32[1,128], index: 8, kind: input, shape index: {}]   ;;  %s1198_s9 = inlined_call_operand.hbm [shape: f32[256,512], index: 9, kind: input, shape index: {}]   ;;  %s1199_s10 = inlined_call_operand.vmem [shape: f32[1,512], index: 10, kind: input, shape index: {}]   ;;  %s1200_s11 = inlined_call_operand.vmem [shape: f32[128,128], index: 11, kind: input, shape index: {}]   ;;  %s1201_s12 = inlined_call_operand.vmem [shape: f32[1,128], index: 12, kind: input, shape index: {}]   ;;  %s1202_s13 = inlined_call_operand.hbm [shape: f32[1,128], index: 13, kind: output, shape index: {0}]   ;;  %s1203_s14 = inlined_call_operand.vmem [shape: f32[1,128], index: 14, kind: output, shape index: {1}, may-alias: {1,14}]   ;;  %s1204_s15 = inlined_call_operand.hbm [shape: f32[1,128], index: 15, kind: output, shape index: {2}]  }
   0x1   :  { %22 = vsyncpa [#allocation6], 0 }
   0x2   :  { %23 = vsyncpa [#allocation4], 0 }
   0x3   :  { %24 = vsyncpa [#allocation10], 0  ;;  %s54_s20 = sshll.u32 %s1196_s7, 4  ;;  %s940_s21 = smov [#allocation5]   ;;  %s55_s20 = int_to_ptr.hbm [resolvable:$true] %s54_s20 }
   0x4   :  { %s56_s22 = sshll.u32 %s940_s21, 4  ;;  %s39_s25 = sshll.u32 %s1194_s5, 4  ;;  %s57_s22 = int_to_ptr.vmem [resolvable:$true] %s56_s22  ;;  %s40_s25 = int_to_ptr.hbm [resolvable:$true] %s39_s25 }
   0x5   :  { %s941_s26 = smov 128   ;;  %s942_s27 = smov 8  }
   0x6   :  { %62 = dma.hbm_to_vmem [thread:$0]  %s55_s20, 4096, %s57_s22, [#allocation6], %s941_s26, %s941_s26, %s942_s27  }
   0x7   :  { %s943_s28 = smov [#allocation2]   ;;  %s69_s17 = sshll.u32 %s1198_s9, 4  ;;  %s70_s17 = int_to_ptr.hbm [resolvable:$true] %s69_s17 }
   0x8   :  { %s41_s29 = sshll.u32 %s943_s28, 4  ;;  %s944_s7 = smov [#allocation7]   ;;  %s42_s29 = int_to_ptr.vmem [resolvable:$true] %s41_s29 }
   0x9   :  { %47 = dma.hbm_to_vmem [thread:$0]  %s40_s25, 4096, %s42_s29, [#allocation3], %s941_s26, %s941_s26, %s942_s27  }
   0xa   :  { %s71_s18 = sshll.u32 %s944_s7, 4  ;;  %s945_s19 = smov 512   ;;  %s72_s18 = int_to_ptr.vmem [resolvable:$true] %s71_s18 }
   0xb   :  { %s946_s21 = smov 32  }
   0xc   :  { %77 = dma.hbm_to_vmem [thread:$0]  %s70_s17, 16384, %s72_s18, [#allocation6], %s945_s19, %s945_s19, %s946_s21  }
   0xd   :  { %932 = dma.done.wait [#allocation3], 4096  }
   0xe   :  { %933 = vsyncadd [#allocation3], 4294963200 }
   0xf   :  { %934 = dma.done.wait [#allocation6], 20480  }
  0x10   :  { %935 = vsyncadd [#allocation6], 4294946816  ;;  %vm104_vm0 = vcmask 1041408   ;;  %vm100_vm1 = vcmask 15360   ;;  %v98_v0 = vld [vmem:[%s1192_s3] sm:$0x3] }
  0x11   :  { %v96_v1 = vld [vmem:[%s1189_s0] sm:$0x1]  ;;  %v159_v2 = vld [vmem:[#allocation2 + $0xf8] sm:$0xff]  ;;  %781 = vmatpush.msk.msra.mxu0 %vm104_vm0, %v98_v0  ;;  %v158_v3 = vld [vmem:[#allocation2 + $0xf0] sm:$0xff]  ;;  %vm201_vm2 = vcmask 1040384   ;;  %s947_s24 = smov [#allocation9]  }
  0x12   :  { %181 = vmatpush.msra.mxu2 %v159_v2  ;;  %v143_v4 = vld [vmem:[#allocation2 + $0x78] sm:$0xff]  ;;  %782 = vmatmul.msk.f32.vlgmr.msra.gmra.mxu0 %vm100_vm1, %v96_v1  ;;  %v157_v5 = vld [vmem:[#allocation2 + $0xe8] sm:$0xff]  ;;  %v142_v7 = vld [vmem:[#allocation2 + $0x70] sm:$0xff]  ;;  %s763_s25 = sshll.u32 %s1204_s15, 4  ;;  %s764_s25 = int_to_ptr.hbm [resolvable:$true] %s763_s25 }
  0x13   :  { %161 = vmatpush.msra.mxu1 %v143_v4  ;;  %v278_v6 = vld [vmem:[#allocation5 + $0x78] sm:$0xff]  ;;  %v277_v8 = vld [vmem:[#allocation5 + $0x70] sm:$0xff]  ;;  %v141_v9 = vld [vmem:[#allocation2 + $0x68] sm:$0xff] }
  0x14   :  { %182 = vmatpush.msra.mxu2 %v158_v3  ;;  %296 = vmatpush.msrb.mxu0 %v278_v6  ;;  %v156_v10 = vld [vmem:[#allocation2 + $0xe0] sm:$0xff]  ;;  %v276_v11 = vld [vmem:[#allocation5 + $0x68] sm:$0xff]  ;;  %v155_v13 = vld [vmem:[#allocation2 + $0xd8] sm:$0xff] }
  0x15   :  { %162 = vmatpush.msra.mxu1 %v142_v7  ;;  %v140_v12 = vld [vmem:[#allocation2 + $0x60] sm:$0xff]  ;;  %v139_v15 = vld [vmem:[#allocation2 + $0x58] sm:$0xff]  ;;  %v154_v16 = vld [vmem:[#allocation2 + $0xd0] sm:$0xff] }
  0x16   :  { %183 = vmatpush.msra.mxu2 %v157_v5  ;;  %297 = vmatpush.msrb.mxu0 %v277_v8  ;;  %v275_v14 = vld [vmem:[#allocation5 + $0x60] sm:$0xff]  ;;  %v274_v17 = vld [vmem:[#allocation5 + $0x58] sm:$0xff]  ;;  %v138_v18 = vld [vmem:[#allocation2 + $0x50] sm:$0xff] }
  0x17   :  { %163 = vmatpush.msra.mxu1 %v141_v9  ;;  %v153_v19 = vld [vmem:[#allocation2 + $0xc8] sm:$0xff]  ;;  %v273_v20 = vld [vmem:[#allocation5 + $0x50] sm:$0xff]  ;;  %v152_v22 = vld [vmem:[#allocation2 + $0xc0] sm:$0xff] }
  0x18   :  { %184 = vmatpush.msra.mxu2 %v156_v10  ;;  %298 = vmatpush.msrb.mxu0 %v276_v11  ;;  %v137_v21 = vld [vmem:[#allocation2 + $0x48] sm:$0xff]  ;;  %v136_v24 = vld [vmem:[#allocation2 + $0x40] sm:$0xff]  ;;  %v151_v25 = vld [vmem:[#allocation2 + $0xb8] sm:$0xff] }
  0x19   :  { %164 = vmatpush.msra.mxu1 %v140_v12  ;;  %v272_v23 = vld [vmem:[#allocation5 + $0x48] sm:$0xff]  ;;  %v271_v26 = vld [vmem:[#allocation5 + $0x40] sm:$0xff]  ;;  %v135_v27 = vld [vmem:[#allocation2 + $0x38] sm:$0xff] }
  0x1a   :  { %185 = vmatpush.msra.mxu2 %v155_v13  ;;  %299 = vmatpush.msrb.mxu0 %v275_v14  ;;  %v150_v28 = vld [vmem:[#allocation2 + $0xb0] sm:$0xff]  ;;  %v270_v29 = vld [vmem:[#allocation5 + $0x38] sm:$0xff]  ;;  %v149_v31 = vld [vmem:[#allocation2 + $0xa8] sm:$0xff] }
  0x1b   :  { %165 = vmatpush.msra.mxu1 %v139_v15  ;;  %v134_v30 = vld [vmem:[#allocation2 + $0x30] sm:$0xff]  ;;  %v133_v33 = vld [vmem:[#allocation2 + $0x28] sm:$0xff]  ;;  %v148_v34 = vld [vmem:[#allocation2 + $0xa0] sm:$0xff] }
  0x1c   :  { %186 = vmatpush.msra.mxu2 %v154_v16  ;;  %300 = vmatpush.msrb.mxu0 %v274_v17  ;;  %v269_v32 = vld [vmem:[#allocation5 + $0x30] sm:$0xff]  ;;  %v268_v35 = vld [vmem:[#allocation5 + $0x28] sm:$0xff]  ;;  %v132_v36 = vld [vmem:[#allocation2 + $0x20] sm:$0xff] }
  0x1d   :  { %166 = vmatpush.msra.mxu1 %v138_v18  ;;  %v147_v37 = vld [vmem:[#allocation2 + $0x98] sm:$0xff]  ;;  %v267_v38 = vld [vmem:[#allocation5 + $0x20] sm:$0xff]  ;;  %v146_v40 = vld [vmem:[#allocation2 + $0x90] sm:$0xff] }
  0x1e   :  { %187 = vmatpush.msra.mxu2 %v153_v19  ;;  %301 = vmatpush.msrb.mxu0 %v273_v20  ;;  %v131_v39 = vld [vmem:[#allocation2 + $0x18] sm:$0xff]  ;;  %v130_v42 = vld [vmem:[#allocation2 + $0x10] sm:$0xff]  ;;  %v145_v43 = vld [vmem:[#allocation2 + $0x88] sm:$0xff] }
  0x1f   :  { %167 = vmatpush.msra.mxu1 %v137_v21  ;;  %v266_v41 = vld [vmem:[#allocation5 + $0x18] sm:$0xff]  ;;  %v265_v44 = vld [vmem:[#allocation5 + $0x10] sm:$0xff]  ;;  %v144_v45 = vld [vmem:[#allocation2 + $0x80] sm:$0xff] }
  0x20   :  { %188 = vmatpush.msra.mxu2 %v152_v22  ;;  %302 = vmatpush.msrb.mxu0 %v272_v23  ;;  %v1047_v46 = vld [vmem:[%s1190_s1] sm:$0x1]  ;;  %v129_v47 = vld [vmem:[#allocation2 + $0x8] sm:$0xff]  ;;  %v242_v60 = vld [vmem:[%s1191_s2 + $0x78] sm:$0xff] }
  0x21   :  { %168 = vmatpush.msra.mxu1 %v136_v24  ;;  %v264_v48 = vld [vmem:[#allocation5 + $0x8] sm:$0xff]  ;;  %v128_v49 = vld [vmem:[#allocation2] sm:$0xff]  ;;  %v241_v61 = vld [vmem:[%s1191_s2 + $0x70] sm:$0xff]  ;;  %243 = vmatpush.msra.mxu3 %v242_v60 }
  0x22   :  { %189 = vmatpush.msra.mxu2 %v151_v25  ;;  %303 = vmatpush.msrb.mxu0 %v271_v26  ;;  %v263_v50 = vld [vmem:[#allocation5] sm:$0xff]  ;;  %v240_v62 = vld [vmem:[%s1191_s2 + $0x68] sm:$0xff]  ;;  %v238_v0 = vld [vmem:[%s1191_s2 + $0x58] sm:$0xff] }
  0x23   :  { %169 = vmatpush.msra.mxu1 %v135_v27  ;;  %v99_v51 = vld [vmem:[%s1193_s4] sm:$0x1]  ;;  %244 = vmatpush.msra.mxu3 %v241_v61  ;;  %v237_v1 = vld [vmem:[%s1191_s2 + $0x50] sm:$0xff]  ;;  %v236_v7 = vld [vmem:[%s1191_s2 + $0x48] sm:$0xff]  ;;  %s750_s4 = sshll.u32 %s1202_s13, 4  ;;  %s751_s4 = int_to_ptr.hbm [resolvable:$true] %s750_s4 }
  0x24   :  { %190 = vmatpush.msra.mxu2 %v150_v28  ;;  %304 = vmatpush.msrb.mxu0 %v270_v29  ;;  %v160_v54 = vld [vmem:[%s1195_s6] sm:$0x1]  ;;  %v234_v9 = vld [vmem:[%s1191_s2 + $0x38] sm:$0xff]  ;;  %v233_v10 = vld [vmem:[%s1191_s2 + $0x30] sm:$0xff] }
  0x25   :  { %170 = vmatpush.msra.mxu1 %v134_v30  ;;  %v239_v63 = vld [vmem:[%s1191_s2 + $0x60] sm:$0xff]  ;;  %245 = vmatpush.msra.mxu3 %v240_v62  ;;  %v232_v11 = vld [vmem:[%s1191_s2 + $0x28] sm:$0xff]  ;;  %v230_v13 = vld [vmem:[%s1191_s2 + $0x18] sm:$0xff] }
  0x26   :  { %191 = vmatpush.msra.mxu2 %v149_v31  ;;  %305 = vmatpush.msrb.mxu0 %v269_v32  ;;  %v235_v8 = vld [vmem:[%s1191_s2 + $0x40] sm:$0xff]  ;;  %v229_v14 = vld [vmem:[%s1191_s2 + $0x10] sm:$0xff]  ;;  %v228_v15 = vld [vmem:[%s1191_s2 + $0x8] sm:$0xff] }
  0x27   :  { %171 = vmatpush.msra.mxu1 %v133_v33  ;;  %246 = vmatpush.msra.mxu3 %v239_v63  ;;  %v231_v12 = vld [vmem:[%s1191_s2 + $0x20] sm:$0xff]  ;;  %v294_v17 = vld [vmem:[#allocation5 + $0xf8] sm:$0xff]  ;;  %v293_v18 = vld [vmem:[#allocation5 + $0xf0] sm:$0xff] }
  0x28   :  { %192 = vmatpush.msra.mxu2 %v148_v34  ;;  %306 = vmatpush.msrb.mxu0 %v268_v35  ;;  %v227_v16 = vld [vmem:[%s1191_s2] sm:$0xff]  ;;  %v292_v19 = vld [vmem:[#allocation5 + $0xe8] sm:$0xff]  ;;  %v290_v21 = vld [vmem:[#allocation5 + $0xd8] sm:$0xff] }
  0x29   :  { %172 = vmatpush.msra.mxu1 %v132_v36  ;;  %247 = vmatpush.msra.mxu3 %v238_v0  ;;  %v291_v20 = vld [vmem:[#allocation5 + $0xe0] sm:$0xff]  ;;  %v289_v22 = vld [vmem:[#allocation5 + $0xd0] sm:$0xff]  ;;  %v288_v23 = vld [vmem:[#allocation5 + $0xc8] sm:$0xff] }
  0x2a   :  { %193 = vmatpush.msra.mxu2 %v147_v37  ;;  %307 = vmatpush.msrb.mxu0 %v267_v38  ;;  %v287_v25 = vld [vmem:[#allocation5 + $0xc0] sm:$0xff]  ;;  %v286_v26 = vld [vmem:[#allocation5 + $0xb8] sm:$0xff]  ;;  %v285_v27 = vld [vmem:[#allocation5 + $0xb0] sm:$0xff] }
  0x2b   :  { %173 = vmatpush.msra.mxu1 %v131_v39  ;;  %248 = vmatpush.msra.mxu3 %v237_v1  ;;  %v284_v28 = vld [vmem:[#allocation5 + $0xa8] sm:$0xff]  ;;  %v283_v31 = vld [vmem:[#allocation5 + $0xa0] sm:$0xff]  ;;  %v282_v33 = vld [vmem:[#allocation5 + $0x98] sm:$0xff] }
  0x2c   :  { %194 = vmatpush.msra.mxu2 %v146_v40  ;;  %308 = vmatpush.msrb.mxu0 %v266_v41  ;;  %v281_v37 = vld [vmem:[#allocation5 + $0x90] sm:$0xff]  ;;  %v280_v39 = vld [vmem:[#allocation5 + $0x88] sm:$0xff]  ;;  %v449_v60 = vld [vmem:[#allocation7 + $0x380] sm:$0xff] }
  0x2d   :  { %174 = vmatpush.msra.mxu1 %v130_v42  ;;  %249 = vmatpush.msra.mxu3 %v236_v7  ;;  %v450_v61 = vld [vmem:[#allocation7 + $0x388] sm:$0xff]  ;;  %v381_v62 = vld [vmem:[#allocation7 + $0x160] sm:$0xff] }
  0x2e   :  { %195 = vmatpush.msra.mxu2 %v145_v43  ;;  %309 = vmatpush.msrb.mxu0 %v265_v44  ;;  %v279_v44 = vld [vmem:[#allocation5 + $0x80] sm:$0xff]  ;;  %v382_v63 = vld [vmem:[#allocation7 + $0x168] sm:$0xff] }
  0x2f   :  { %175 = vmatpush.msra.mxu1 %v129_v47  ;;  %250 = vmatpush.msra.mxu3 %v235_v8  ;;  %v398_v47 = vld [vmem:[#allocation7 + $0x1e8] sm:$0xff]  ;;  %v445_v0 = vld [vmem:[#allocation7 + $0x360] sm:$0xff] }
  0x30   :  { %196 = vmatpush.msra.mxu2 %v144_v45  ;;  %310 = vmatpush.msrb.mxu0 %v264_v48  ;;  %v397_v45 = vld [vmem:[#allocation7 + $0x1e0] sm:$0xff]  ;;  %v446_v1 = vld [vmem:[#allocation7 + $0x368] sm:$0xff] }
  0x31   :  { %197 = vmatmul.f32.vlgmr.msra.gmra.mxu2 %v1047_v46  ;;  %176 = vmatpush.msra.mxu1 %v128_v49  ;;  %v393_v48 = vld [vmem:[#allocation7 + $0x1c0] sm:$0xff]  ;;  %v374_v7 = vld [vmem:[#allocation7 + $0x128] sm:$0xff] }
  0x32   :  { %311 = vmatpush.msrb.mxu0 %v263_v50  ;;  %251 = vmatpush.msra.mxu3 %v234_v9  ;;  %v461_v49 = vld [vmem:[#allocation7 + $0x3e0] sm:$0xff]  ;;  %v394_v50 = vld [vmem:[#allocation7 + $0x1c8] sm:$0xff] }
  0x33   :  { %316 = vmatpush.msrb.mxu1 %v294_v17  ;;  %475 = vmatpush.msrb.mxu2 %v397_v45  ;;  %v437_v8 = vld [vmem:[#allocation7 + $0x320] sm:$0xff]  ;;  %v438_v9 = vld [vmem:[#allocation7 + $0x328] sm:$0xff]  ;;  %v400_v45 = vld [vmem:[#allocation7 + $0x1f8] sm:$0xff] }
  0x34   :  { %252 = vmatpush.msra.mxu3 %v233_v10  ;;  %515 = vmatpush.msra.mxu0 %v398_v47  ;;  %v369_v10 = vld [vmem:[#allocation7 + $0x100] sm:$0xff]  ;;  %v430_v17 = vld [vmem:[#allocation7 + $0x2e8] sm:$0xff] }
  0x35   :  { %317 = vmatpush.msrb.mxu1 %v293_v18  ;;  %476 = vmatpush.msrb.mxu2 %v393_v48  ;;  %v361_v18 = vld [vmem:[#allocation7 + $0xc0] sm:$0xff] }
  0x36   :  { %253 = vmatpush.msra.mxu3 %v232_v11  ;;  %516 = vmatpush.msra.mxu0 %v394_v50  ;;  %v370_v11 = vld [vmem:[#allocation7 + $0x108] sm:$0xff]  ;;  %v401_v47 = vld [vmem:[#allocation7 + $0x200] sm:$0xff]  ;;  %v395_v50 = vld [vmem:[#allocation7 + $0x1d0] sm:$0xff] }
  0x37   :  { %318 = vmatpush.msrb.mxu1 %v292_v19  ;;  %v362_v19 = vld [vmem:[#allocation7 + $0xc8] sm:$0xff] }
  0x38   :  { %254 = vmatpush.msra.mxu3 %v231_v12  ;;  %v433_v12 = vld [vmem:[#allocation7 + $0x300] sm:$0xff] }
  0x39   :  { %319 = vmatpush.msrb.mxu1 %v291_v20  ;;  %v425_v20 = vld [vmem:[#allocation7 + $0x2c0] sm:$0xff] }
  0x3a   :  { %255 = vmatpush.msra.mxu3 %v230_v13  ;;  %v434_v13 = vld [vmem:[#allocation7 + $0x308] sm:$0xff] }
  0x3b   :  { %320 = vmatpush.msrb.mxu1 %v290_v21  ;;  %v426_v21 = vld [vmem:[#allocation7 + $0x2c8] sm:$0xff] }
  0x3c   :  { %256 = vmatpush.msra.mxu3 %v229_v14  ;;  %v365_v14 = vld [vmem:[#allocation7 + $0xe0] sm:$0xff] }
  0x3d   :  { %321 = vmatpush.msrb.mxu1 %v289_v22  ;;  %v357_v22 = vld [vmem:[#allocation7 + $0xa0] sm:$0xff] }
  0x3e   :  { %257 = vmatpush.msra.mxu3 %v228_v15  ;;  %v366_v15 = vld [vmem:[#allocation7 + $0xe8] sm:$0xff] }
  0x3f   :  { %322 = vmatpush.msrb.mxu1 %v288_v23  ;;  %v358_v23 = vld [vmem:[#allocation7 + $0xa8] sm:$0xff] }
  0x40   :  { %258 = vmatpush.msra.mxu3 %v227_v16  ;;  %v429_v16 = vld [vmem:[#allocation7 + $0x2e0] sm:$0xff] }
  0x41   :  { %323 = vmatpush.msrb.mxu1 %v287_v25  ;;  %v422_v25 = vld [vmem:[#allocation7 + $0x2a8] sm:$0xff] }
  0x42   :  { %495 = vmatpush.msrb.mxu3 %v461_v49  ;;  %v402_v49 = vld [vmem:[#allocation7 + $0x208] sm:$0xff] }
  0x43   :  { %324 = vmatpush.msrb.mxu1 %v286_v26  ;;  %v353_v26 = vld [vmem:[#allocation7 + $0x80] sm:$0xff] }
  0x45   :  { %325 = vmatpush.msrb.mxu1 %v285_v27  ;;  %v354_v27 = vld [vmem:[#allocation7 + $0x88] sm:$0xff] }
  0x47   :  { %326 = vmatpush.msrb.mxu1 %v284_v28  ;;  %v417_v28 = vld [vmem:[#allocation7 + $0x280] sm:$0xff] }
  0x49   :  { %327 = vmatpush.msrb.mxu1 %v283_v31  ;;  %v350_v31 = vld [vmem:[#allocation7 + $0x68] sm:$0xff] }
  0x4b   :  { %328 = vmatpush.msrb.mxu1 %v282_v33  ;;  %v414_v33 = vld [vmem:[#allocation7 + $0x268] sm:$0xff] }
  0x4d   :  { %329 = vmatpush.msrb.mxu1 %v281_v37  ;;  %v410_v37 = vld [vmem:[#allocation7 + $0x248] sm:$0xff] }
  0x4f   :  { %330 = vmatpush.msrb.mxu1 %v280_v39  ;;  %v342_v39 = vld [vmem:[#allocation7 + $0x28] sm:$0xff] }
  0x51   :  { %331 = vmatpush.msrb.mxu1 %v279_v44  ;;  %v399_v44 = vld [vmem:[#allocation7 + $0x1f0] sm:$0xff] }
  0x8f   :  { %v125_v52 = vpop.f32.mrf.mxu0 }
  0x90   :  { %v126_v53 = vadd.f32 %v125_v52, %v99_v51  ;;  %v462_v51 = vld [vmem:[#allocation7 + $0x3e8] sm:$0xff]  ;;  %v389_v52 = vld [vmem:[#allocation7 + $0x1a0] sm:$0xff] }
  0x91   :  { %477 = vmatpush.msrb.mxu2 %v389_v52  ;;  %v396_v52 = vld [vmem:[#allocation7 + $0x1d8] sm:$0xff] }
  0x92   :  { %177 = vmatmul.f32.vlgmr.msra.gmra.mxu1 %v126_v53  ;;  %312 = vmatmul.f32.vlgmr.msrb.gmra.mxu0 %v126_v53  ;;  %v457_v53 = vld [vmem:[#allocation7 + $0x3c0] sm:$0xff] }
  0x93   :  { %535 = vmatpush.msra.mxu1 %v462_v51  ;;  %496 = vmatpush.msrb.mxu3 %v457_v53  ;;  %v463_v51 = vld [vmem:[#allocation7 + $0x3f0] sm:$0xff]  ;;  %v464_v53 = vld [vmem:[#allocation7 + $0x3f8] sm:$0xff] }
  0xb4   :  { %v198_v56 = vpop.f32.mrf.mxu2 }
 0x10f   :  { %v178_v55 = vpop.f32.mrf.mxu1 }
 0x110   :  { %v179_v57 = vadd.f32 %v178_v55, %v160_v54  ;;  %v390_v54 = vld [vmem:[#allocation7 + $0x1a8] sm:$0xff] }
 0x111   :  { %v458_v55 = vld [vmem:[#allocation7 + $0x3c8] sm:$0xff]  ;;  %517 = vmatpush.msra.mxu0 %v390_v54  ;;  %v391_v54 = vld [vmem:[#allocation7 + $0x1b0] sm:$0xff] }
 0x112   :  { %v199_v58 = vadd.f32 %v198_v56, %v179_v57  ;;  %v453_v56 = vld [vmem:[#allocation7 + $0x3a0] sm:$0xff]  ;;  %536 = vmatpush.msra.mxu1 %v458_v55  ;;  %v459_v55 = vld [vmem:[#allocation7 + $0x3d0] sm:$0xff] }
 0x113   :  { %v385_v57 = vld [vmem:[#allocation7 + $0x180] sm:$0xff]  ;;  %497 = vmatpush.msrb.mxu3 %v453_v56  ;;  %v392_v56 = vld [vmem:[#allocation7 + $0x1b8] sm:$0xff] }
 0x114   :  { %v202_v59 = vsel %vm201_vm2, %v199_v58, -inf  ;;  %478 = vmatpush.msrb.mxu2 %v385_v57  ;;  %v460_v57 = vld [vmem:[#allocation7 + $0x3d8] sm:$0xff] }
 0x115   :  { %203 = vmax.xlane.f32.xlu0 %v202_v59  ;;  %v454_v59 = vld [vmem:[#allocation7 + $0x3a8] sm:$0xff]  ;;  %498 = vmatpush.msrb.mxu3 %v449_v60  ;;  %v388_v60 = vld [vmem:[#allocation7 + $0x198] sm:$0xff] }
 0x116   :  { %537 = vmatpush.msra.mxu1 %v454_v59  ;;  %479 = vmatpush.msrb.mxu2 %v381_v62  ;;  %v455_v59 = vld [vmem:[#allocation7 + $0x3b0] sm:$0xff] }
 0x117   :  { %499 = vmatpush.msrb.mxu3 %v445_v0  ;;  %v383_v62 = vld [vmem:[#allocation7 + $0x170] sm:$0xff]  ;;  %v384_v0 = vld [vmem:[#allocation7 + $0x178] sm:$0xff] }
 0x118   :  { %538 = vmatpush.msra.mxu1 %v450_v61  ;;  %v456_v61 = vld [vmem:[#allocation7 + $0x3b8] sm:$0xff] }
 0x11a   :  { %539 = vmatpush.msra.mxu1 %v446_v1  ;;  %v452_v1 = vld [vmem:[#allocation7 + $0x398] sm:$0xff] }
 0x188   :  { %v204_v2 = vpop.xlane.xlu0 %203 }
 0x189   :  { %v205_v3 = vsub.f32 %v199_v58, %v204_v2  ;;  %v386_v58 = vld [vmem:[#allocation7 + $0x188] sm:$0xff]  ;;  %v377_v2 = vld [vmem:[#allocation7 + $0x140] sm:$0xff] }
 0x18a   :  { %518 = vmatpush.msra.mxu0 %v386_v58  ;;  %480 = vmatpush.msrb.mxu2 %v377_v2  ;;  %v387_v58 = vld [vmem:[#allocation7 + $0x190] sm:$0xff] }
 0x18b   :  { %v206_v4 = vmul.f32 1.442695, %v205_v3  ;;  %v378_v3 = vld [vmem:[#allocation7 + $0x148] sm:$0xff]  ;;  %v379_v2 = vld [vmem:[#allocation7 + $0x150] sm:$0xff] }
 0x18c   :  { %519 = vmatpush.msra.mxu0 %v382_v63  ;;  %v451_v63 = vld [vmem:[#allocation7 + $0x390] sm:$0xff] }
 0x18d   :  { %794 = vpow2.f32 %v206_v4  ;;  %v441_v4 = vld [vmem:[#allocation7 + $0x340] sm:$0xff] }
 0x18e   :  { %520 = vmatpush.msra.mxu0 %v378_v3  ;;  %500 = vmatpush.msrb.mxu3 %v441_v4  ;;  %v447_v3 = vld [vmem:[#allocation7 + $0x370] sm:$0xff]  ;;  %v380_v4 = vld [vmem:[#allocation7 + $0x158] sm:$0xff] }
 0x190   :  { %521 = vmatpush.msra.mxu0 %v374_v7  ;;  %501 = vmatpush.msrb.mxu3 %v437_v8  ;;  %v443_v7 = vld [vmem:[#allocation7 + $0x350] sm:$0xff]  ;;  %v376_v8 = vld [vmem:[#allocation7 + $0x138] sm:$0xff] }
 0x192   :  { %522 = vmatpush.msra.mxu0 %v370_v11  ;;  %502 = vmatpush.msrb.mxu3 %v433_v12  ;;  %v439_v11 = vld [vmem:[#allocation7 + $0x330] sm:$0xff]  ;;  %v372_v12 = vld [vmem:[#allocation7 + $0x118] sm:$0xff] }
 0x193   :  { %v1075_v5 = vpop.eup %794 }
 0x194   :  { %v208_v6 = vsel %vm201_vm2, %v1075_v5, 0.0  ;;  %523 = vmatpush.msra.mxu0 %v366_v15  ;;  %503 = vmatpush.msrb.mxu3 %v429_v16  ;;  %v435_v15 = vld [vmem:[#allocation7 + $0x310] sm:$0xff]  ;;  %v368_v16 = vld [vmem:[#allocation7 + $0xf8] sm:$0xff] }
 0x195   :  { %209 = vadd.xlane.f32.xlu0 %v208_v6  ;;  %v373_v6 = vld [vmem:[#allocation7 + $0x120] sm:$0xff] }
 0x196   :  { %481 = vmatpush.msrb.mxu2 %v373_v6  ;;  %524 = vmatpush.msra.mxu0 %v362_v19  ;;  %v375_v6 = vld [vmem:[#allocation7 + $0x130] sm:$0xff] }
 0x197   :  { %504 = vmatpush.msrb.mxu3 %v425_v20  ;;  %v431_v19 = vld [vmem:[#allocation7 + $0x2f0] sm:$0xff]  ;;  %v364_v20 = vld [vmem:[#allocation7 + $0xd8] sm:$0xff] }
 0x198   :  { %482 = vmatpush.msrb.mxu2 %v369_v10  ;;  %525 = vmatpush.msra.mxu0 %v358_v23  ;;  %v371_v10 = vld [vmem:[#allocation7 + $0x110] sm:$0xff] }
 0x199   :  { %v427_v23 = vld [vmem:[#allocation7 + $0x2d0] sm:$0xff] }
 0x19a   :  { %483 = vmatpush.msrb.mxu2 %v365_v14  ;;  %526 = vmatpush.msra.mxu0 %v354_v27  ;;  %v367_v14 = vld [vmem:[#allocation7 + $0xf0] sm:$0xff] }
 0x19b   :  { %v423_v27 = vld [vmem:[#allocation7 + $0x2b0] sm:$0xff] }
 0x19c   :  { %484 = vmatpush.msrb.mxu2 %v361_v18  ;;  %527 = vmatpush.msra.mxu0 %v350_v31  ;;  %v363_v18 = vld [vmem:[#allocation7 + $0xd0] sm:$0xff] }
 0x19d   :  { %v419_v31 = vld [vmem:[#allocation7 + $0x290] sm:$0xff] }
 0x19e   :  { %485 = vmatpush.msrb.mxu2 %v357_v22  ;;  %v359_v22 = vld [vmem:[#allocation7 + $0xb0] sm:$0xff] }
 0x1a0   :  { %486 = vmatpush.msrb.mxu2 %v353_v26  ;;  %v355_v26 = vld [vmem:[#allocation7 + $0x90] sm:$0xff] }
 0x208   :  { %v210_v24 = vpop.xlane.xlu0 %209 }
 0x209   :  { %796 = vrcp.f32 %v210_v24  ;;  %v222_v34 = vand.u32 2147483648, %v210_v24  ;;  %v220_v36 = vand.u32 2147483647, %v210_v24  ;;  %vm216_vm4 = vweird.f32 %v210_v24 }
 0x20b   :  { %v223_v40 = vor.u32 1.1754944e-38, %v222_v34  ;;  %vm221_vm6 = vcmp.eq.f32.partialorder %v220_v36, 8.507059e+37  ;;  %v345_v34 = vld [vmem:[#allocation7 + $0x40] sm:$0xff] }
 0x20c   :  { %v409_v36 = vld [vmem:[#allocation7 + $0x240] sm:$0xff] }
 0x20f   :  { %v797_v29 = vpop.eup %796 }
 0x210   :  { %v212_v30 = vmul.f32 %v797_v29, %v210_v24  ;;  %vm217_vm3 = vweird.f32 %v797_v29  ;;  %v421_v24 = vld [vmem:[#allocation7 + $0x2a0] sm:$0xff] }
 0x211   :  { %vm218_vm5 = vmor %vm216_vm4, %vm217_vm3  ;;  %505 = vmatpush.msrb.mxu3 %v421_v24  ;;  %v360_v24 = vld [vmem:[#allocation7 + $0xb8] sm:$0xff] }
 0x212   :  { %v213_v32 = vsub.f32 1.0, %v212_v30  ;;  %v349_v30 = vld [vmem:[#allocation7 + $0x60] sm:$0xff] }
 0x213   :  { %506 = vmatpush.msrb.mxu3 %v417_v28  ;;  %487 = vmatpush.msrb.mxu2 %v349_v30  ;;  %v356_v28 = vld [vmem:[#allocation7 + $0x98] sm:$0xff]  ;;  %v351_v30 = vld [vmem:[#allocation7 + $0x70] sm:$0xff] }
 0x214   :  { %v214_v35 = vmul.f32 %v797_v29, %v213_v32  ;;  %v413_v32 = vld [vmem:[#allocation7 + $0x260] sm:$0xff] }
 0x215   :  { %507 = vmatpush.msrb.mxu3 %v413_v32  ;;  %488 = vmatpush.msrb.mxu2 %v345_v34  ;;  %v352_v32 = vld [vmem:[#allocation7 + $0x78] sm:$0xff]  ;;  %v347_v34 = vld [vmem:[#allocation7 + $0x50] sm:$0xff] }
 0x216   :  { %v215_v38 = vadd.f32 %v797_v29, %v214_v35  ;;  %v346_v35 = vld [vmem:[#allocation7 + $0x48] sm:$0xff] }
 0x217   :  { %528 = vmatpush.msra.mxu0 %v346_v35  ;;  %508 = vmatpush.msrb.mxu3 %v409_v36  ;;  %v415_v35 = vld [vmem:[#allocation7 + $0x270] sm:$0xff]  ;;  %v348_v36 = vld [vmem:[#allocation7 + $0x58] sm:$0xff] }
 0x218   :  { %v219_v41 = vsel %vm218_vm5, %v797_v29, %v215_v38  ;;  %v418_v29 = vld [vmem:[#allocation7 + $0x288] sm:$0xff]  ;;  %v341_v38 = vld [vmem:[#allocation7 + $0x20] sm:$0xff] }
 0x219   :  { %v224_v42 = vsel %vm221_vm6, %v223_v40, %v219_v41  ;;  %v405_v40 = vld [vmem:[#allocation7 + $0x220] sm:$0xff]  ;;  %v406_v41 = vld [vmem:[#allocation7 + $0x228] sm:$0xff]  ;;  %489 = vmatpush.msrb.mxu2 %v341_v38  ;;  %529 = vmatpush.msra.mxu0 %v342_v39  ;;  %v343_v38 = vld [vmem:[#allocation7 + $0x30] sm:$0xff] }
 0x21a   :  { %v225_v43 = vmul.f32 %v1075_v5, %v224_v42  ;;  %v442_v5 = vld [vmem:[#allocation7 + $0x348] sm:$0xff]  ;;  %v337_v42 = vld [vmem:[#allocation7] sm:$0xff]  ;;  %509 = vmatpush.msrb.mxu3 %v405_v40  ;;  %v411_v39 = vld [vmem:[#allocation7 + $0x250] sm:$0xff] }
 0x21b   :  { %540 = vmatpush.msra.mxu1 %v442_v5  ;;  %490 = vmatpush.msrb.mxu2 %v337_v42  ;;  %v448_v5 = vld [vmem:[#allocation7 + $0x378] sm:$0xff]  ;;  %v339_v42 = vld [vmem:[#allocation7 + $0x10] sm:$0xff] }
 0x21c   :  { %259 = vmatmul.f32.vlgmr.msra.gmra.mxu3 %v225_v43  ;;  %226 = vst [vmem:[#allocation9] sm:$0x1] %v225_v43  ;;  %v338_v43 = vld [vmem:[#allocation7 + $0x8] sm:$0xff]  ;;  %v344_v40 = vld [vmem:[#allocation7 + $0x38] sm:$0xff] }
 0x21d   :  { %541 = vmatpush.msra.mxu1 %v438_v9  ;;  %530 = vmatpush.msra.mxu0 %v338_v43  ;;  %v444_v9 = vld [vmem:[#allocation7 + $0x358] sm:$0xff]  ;;  %v407_v43 = vld [vmem:[#allocation7 + $0x230] sm:$0xff] }
 0x21e   :  { %555 = vmatpush.msra.mxu2 %v399_v44  ;;  %510 = vmatpush.msrb.mxu3 %v401_v47  ;;  %v340_v44 = vld [vmem:[#allocation7 + $0x18] sm:$0xff]  ;;  %v403_v47 = vld [vmem:[#allocation7 + $0x210] sm:$0xff] }
 0x21f   :  { %542 = vmatpush.msra.mxu1 %v434_v13  ;;  %595 = vmatpush.msrb.mxu0 %v400_v45  ;;  %v440_v13 = vld [vmem:[#allocation7 + $0x338] sm:$0xff] }
 0x220   :  { %556 = vmatpush.msra.mxu2 %v395_v50  ;;  %575 = vmatpush.msra.mxu3 %v463_v51  ;;  %v408_v45 = vld [vmem:[#allocation7 + $0x238] sm:$0xff]  ;;  %v313_v50 = vpop.f32.mrf.mxu0 }
 0x221   :  { %543 = vmatpush.msra.mxu1 %v430_v17  ;;  %596 = vmatpush.msrb.mxu0 %v396_v52  ;;  %v436_v17 = vld [vmem:[#allocation7 + $0x318] sm:$0xff] }
 0x222   :  { %557 = vmatpush.msra.mxu2 %v391_v54  ;;  %576 = vmatpush.msra.mxu3 %v459_v55  ;;  %v696_v55 = vld [vmem:[%s1200_s11 + $0x78] sm:$0xff] }
 0x223   :  { %544 = vmatpush.msra.mxu1 %v426_v21  ;;  %597 = vmatpush.msrb.mxu0 %v392_v56  ;;  %v432_v21 = vld [vmem:[#allocation7 + $0x2f8] sm:$0xff]  ;;  %v695_v56 = vld [vmem:[%s1200_s11 + $0x70] sm:$0xff] }
 0x224   :  { %558 = vmatpush.msra.mxu2 %v387_v58  ;;  %577 = vmatpush.msra.mxu3 %v455_v59  ;;  %v694_v58 = vld [vmem:[%s1200_s11 + $0x68] sm:$0xff]  ;;  %v693_v59 = vld [vmem:[%s1200_s11 + $0x60] sm:$0xff] }
 0x225   :  { %545 = vmatpush.msra.mxu1 %v422_v25  ;;  %598 = vmatpush.msrb.mxu0 %v388_v60  ;;  %v428_v25 = vld [vmem:[#allocation7 + $0x2d8] sm:$0xff] }
 0x226   :  { %559 = vmatpush.msra.mxu2 %v383_v62  ;;  %578 = vmatpush.msra.mxu3 %v451_v63 }
 0x227   :  { %546 = vmatpush.msra.mxu1 %v418_v29  ;;  %599 = vmatpush.msrb.mxu0 %v384_v0  ;;  %v424_v29 = vld [vmem:[#allocation7 + $0x2b8] sm:$0xff]  ;;  %v691_v0 = vld [vmem:[%s1200_s11 + $0x50] sm:$0xff] }
 0x228   :  { %560 = vmatpush.msra.mxu2 %v379_v2  ;;  %579 = vmatpush.msra.mxu3 %v447_v3  ;;  %v690_v2 = vld [vmem:[%s1200_s11 + $0x48] sm:$0xff] }
 0x229   :  { %547 = vmatpush.msra.mxu1 %v414_v33  ;;  %600 = vmatpush.msrb.mxu0 %v380_v4  ;;  %v420_v33 = vld [vmem:[#allocation7 + $0x298] sm:$0xff] }
 0x22a   :  { %561 = vmatpush.msra.mxu2 %v375_v6  ;;  %580 = vmatpush.msra.mxu3 %v443_v7 }
 0x22b   :  { %548 = vmatpush.msra.mxu1 %v410_v37  ;;  %601 = vmatpush.msrb.mxu0 %v376_v8  ;;  %v416_v37 = vld [vmem:[#allocation7 + $0x278] sm:$0xff] }
 0x22c   :  { %562 = vmatpush.msra.mxu2 %v371_v10  ;;  %581 = vmatpush.msra.mxu3 %v439_v11  ;;  %v687_v11 = vld [vmem:[%s1200_s11 + $0x30] sm:$0xff] }
 0x22d   :  { %549 = vmatpush.msra.mxu1 %v406_v41  ;;  %602 = vmatpush.msrb.mxu0 %v372_v12  ;;  %v412_v41 = vld [vmem:[#allocation7 + $0x258] sm:$0xff] }
 0x22e   :  { %563 = vmatpush.msra.mxu2 %v367_v14  ;;  %582 = vmatpush.msra.mxu3 %v435_v15  ;;  %v685_v15 = vld [vmem:[%s1200_s11 + $0x20] sm:$0xff] }
 0x22f   :  { %550 = vmatpush.msra.mxu1 %v402_v49  ;;  %603 = vmatpush.msrb.mxu0 %v368_v16  ;;  %v295_v49 = vld [vmem:[%s1197_s8] sm:$0x1]  ;;  %v684_v16 = vld [vmem:[%s1200_s11 + $0x18] sm:$0xff] }
 0x230   :  { %511 = vmatmul.f32.vlgmr.msrb.gmra.mxu3 %v1047_v46  ;;  %564 = vmatpush.msra.mxu2 %v363_v18  ;;  %v314_v51 = vadd.f32 %v313_v50, %v295_v49 }
 0x231   :  { %583 = vmatpush.msra.mxu3 %v431_v19  ;;  %604 = vmatpush.msrb.mxu0 %v364_v20  ;;  %v683_v19 = vld [vmem:[%s1200_s11 + $0x10] sm:$0xff]  ;;  %v682_v20 = vld [vmem:[%s1200_s11 + $0x8] sm:$0xff] }
 0x232   :  { %565 = vmatpush.msra.mxu2 %v359_v22 }
 0x233   :  { %584 = vmatpush.msra.mxu3 %v427_v23  ;;  %605 = vmatpush.msrb.mxu0 %v360_v24 }
 0x234   :  { %566 = vmatpush.msra.mxu2 %v355_v26 }
 0x235   :  { %585 = vmatpush.msra.mxu3 %v423_v27  ;;  %606 = vmatpush.msrb.mxu0 %v356_v28 }
 0x236   :  { %567 = vmatpush.msra.mxu2 %v351_v30 }
 0x237   :  { %586 = vmatpush.msra.mxu3 %v419_v31  ;;  %607 = vmatpush.msrb.mxu0 %v352_v32 }
 0x238   :  { %568 = vmatpush.msra.mxu2 %v347_v34 }
 0x239   :  { %587 = vmatpush.msra.mxu3 %v415_v35  ;;  %608 = vmatpush.msrb.mxu0 %v348_v36 }
 0x23a   :  { %569 = vmatpush.msra.mxu2 %v343_v38 }
 0x23b   :  { %588 = vmatpush.msra.mxu3 %v411_v39  ;;  %609 = vmatpush.msrb.mxu0 %v344_v40 }
 0x23c   :  { %570 = vmatpush.msra.mxu2 %v339_v42 }
 0x23d   :  { %589 = vmatpush.msra.mxu3 %v407_v43  ;;  %610 = vmatpush.msrb.mxu0 %v340_v44 }
 0x23f   :  { %590 = vmatpush.msra.mxu3 %v403_v47 }
 0x240   :  { %591 = vmatmul.f32.vlgmr.msra.gmra.mxu3 %v1047_v46 }
 0x29f   :  { %v260_v48 = vpop.f32.mrf.mxu3 }
 0x2a0   :  { %332 = vmatmul.f32.vlgmr.msrb.gmra.mxu1 %v260_v48  ;;  %v404_v48 = vld [vmem:[#allocation7 + $0x218] sm:$0xff] }
 0x2a1   :  { %615 = vmatpush.msrb.mxu1 %v464_v53 }
 0x2a3   :  { %616 = vmatpush.msrb.mxu1 %v460_v57  ;;  %v1126_v57 = vld [vmem:[%s1199_s10] sm:$0xf] }
 0x2a4   :  { %v468_v60 = vperm.slane %v1126_v57, 1  ;;  %v467_v4 = vperm.slane %v1126_v57, 0  ;;  %v470_v27 = vperm.slane %v1126_v57, 3  ;;  %v469_v32 = vperm.slane %v1126_v57, 2 }
 0x2a5   :  { %617 = vmatpush.msrb.mxu1 %v456_v61  ;;  %v692_v61 = vld [vmem:[%s1200_s11 + $0x58] sm:$0xff] }
 0x2a7   :  { %618 = vmatpush.msrb.mxu1 %v452_v1 }
 0x2a8   :  { %551 = vmatmul.f32.vlgmr.msra.gmra.mxu1 %v1047_v46 }
 0x2a9   :  { %619 = vmatpush.msrb.mxu1 %v448_v5  ;;  %v689_v5 = vld [vmem:[%s1200_s11 + $0x40] sm:$0xff] }
 0x2ab   :  { %620 = vmatpush.msrb.mxu1 %v444_v9  ;;  %v688_v9 = vld [vmem:[%s1200_s11 + $0x38] sm:$0xff] }
 0x2ad   :  { %621 = vmatpush.msrb.mxu1 %v440_v13  ;;  %v686_v13 = vld [vmem:[%s1200_s11 + $0x28] sm:$0xff] }
 0x2af   :  { %622 = vmatpush.msrb.mxu1 %v436_v17 }
 0x2b1   :  { %623 = vmatpush.msrb.mxu1 %v432_v21  ;;  %v681_v21 = vld [vmem:[%s1200_s11] sm:$0xff] }
 0x2b3   :  { %624 = vmatpush.msrb.mxu1 %v428_v25  ;;  %v512_v8 = vpop.f32.mrf.mxu3 }
 0x2b5   :  { %625 = vmatpush.msrb.mxu1 %v424_v29 }
 0x2b7   :  { %626 = vmatpush.msrb.mxu1 %v420_v33 }
 0x2b9   :  { %627 = vmatpush.msrb.mxu1 %v416_v37 }
 0x2bb   :  { %628 = vmatpush.msrb.mxu1 %v412_v41 }
 0x2bd   :  { %629 = vmatpush.msrb.mxu1 %v408_v45 }
 0x2bf   :  { %630 = vmatpush.msrb.mxu1 %v404_v48 }
 0x2c0   :  { %631 = vmatmul.f32.vlgmr.msrb.gmra.mxu1 %v1047_v46 }
 0x2c3   :  { %v592_v43 = vpop.f32.mrf.mxu3 }
 0x31d   :  { %v333_v52 = vpop.f32.mrf.mxu1 }
 0x31e   :  { %v334_v53 = vadd.f32 %v333_v52, %v314_v51 }
 0x320   :  { %v336_v54 = vmax.f32 %v334_v53, 0.0 }
 0x322   :  { %491 = vmatmul.f32.vlgmr.msrb.gmra.mxu2 %v336_v54  ;;  %531 = vmatmul.f32.vlgmr.msra.gmra.mxu0 %v336_v54 }
 0x323   :  { %698 = vmatpush.msrb.mxu2 %v696_v55 }
 0x325   :  { %699 = vmatpush.msrb.mxu2 %v695_v56  ;;  %v552_v63 = vpop.f32.mrf.mxu1 }
 0x327   :  { %700 = vmatpush.msrb.mxu2 %v694_v58 }
 0x329   :  { %701 = vmatpush.msrb.mxu2 %v693_v59 }
 0x32a   :  { %571 = vmatmul.f32.vlgmr.msra.gmra.mxu2 %v336_v54  ;;  %611 = vmatmul.f32.vlgmr.msrb.gmra.mxu0 %v336_v54 }
 0x32b   :  { %702 = vmatpush.msrb.mxu2 %v692_v61 }
 0x32d   :  { %703 = vmatpush.msrb.mxu2 %v691_v0 }
 0x32f   :  { %704 = vmatpush.msrb.mxu2 %v690_v2 }
 0x331   :  { %705 = vmatpush.msrb.mxu2 %v689_v5 }
 0x333   :  { %706 = vmatpush.msrb.mxu2 %v688_v9 }
 0x335   :  { %707 = vmatpush.msrb.mxu2 %v687_v11 }
 0x337   :  { %708 = vmatpush.msrb.mxu2 %v686_v13 }
 0x339   :  { %709 = vmatpush.msrb.mxu2 %v685_v15 }
 0x33b   :  { %710 = vmatpush.msrb.mxu2 %v684_v16 }
 0x33d   :  { %711 = vmatpush.msrb.mxu2 %v683_v19  ;;  %v632_v39 = vpop.f32.mrf.mxu1 }
 0x33f   :  { %712 = vmatpush.msrb.mxu2 %v682_v20 }
 0x341   :  { %713 = vmatpush.msrb.mxu2 %v681_v21 }
 0x39f   :  { %v532_v62 = vpop.f32.mrf.mxu0 }
 0x3a0   :  { %v533_v1 = vadd.f32 %v532_v62, %v468_v60  ;;  %v697_v62 = vld [vmem:[%s1201_s12] sm:$0x1]  ;;  %s948_s12 = smov [#allocation8]  }
 0x3a1   :  { %s748_s26 = sshll.u32 %s948_s12, 4  ;;  %s749_s26 = int_to_ptr.vmem [resolvable:$true] %s748_s26 }
 0x3a2   :  { %v553_v3 = vadd.f32 %v552_v63, %v533_v1 }
 0x3a4   :  { %v784_v6 = vmul.f32 -1.442695, %v553_v3 }
 0x3a5   :  { %v492_v7 = vpop.f32.mrf.mxu2 }
 0x3a6   :  { %798 = vpow2.f32 %v784_v6  ;;  %v493_v10 = vadd.f32 %v492_v7, %v467_v4 }
 0x3a7   :  { %v612_v30 = vpop.f32.mrf.mxu0 }
 0x3a8   :  { %v513_v12 = vadd.f32 %v512_v8, %v493_v10  ;;  %v613_v35 = vadd.f32 %v612_v30, %v470_v27 }
 0x3aa   :  { %v783_v14 = vmul.f32 -1.442695, %v513_v12  ;;  %v633_v44 = vadd.f32 %v632_v39, %v613_v35 }
 0x3ac   :  { %v799_v17 = vpop.eup %798  ;;  %800 = vpow2.f32 %v783_v14 }
 0x3ad   :  { %v657_v18 = vadd.f32 1.0, %v799_v17  ;;  %v572_v34 = vpop.f32.mrf.mxu2 }
 0x3ae   :  { %v573_v41 = vadd.f32 %v572_v34, %v469_v32 }
 0x3af   :  { %802 = vrcp.f32 %v657_v18  ;;  %v669_v51 = vand.u32 2147483648, %v657_v18  ;;  %vm663_vm12 = vweird.f32 %v657_v18  ;;  %v667_v52 = vand.u32 2147483647, %v657_v18 }
 0x3b0   :  { %v593_v50 = vadd.f32 %v592_v43, %v573_v41 }
 0x3b1   :  { %v670_v55 = vor.u32 1.1754944e-38, %v669_v51  ;;  %vm668_vm14 = vcmp.eq.f32.partialorder %v667_v52, 8.507059e+37 }
 0x3b2   :  { %v801_v22 = vpop.eup %800 }
 0x3b3   :  { %v638_v23 = vadd.f32 1.0, %v801_v22 }
 0x3b5   :  { %804 = vrcp.f32 %v638_v23  ;;  %v803_v24 = vpop.eup %802  ;;  %v650_v33 = vand.u32 2147483648, %v638_v23  ;;  %v648_v37 = vand.u32 2147483647, %v638_v23  ;;  %vm644_vm8 = vweird.f32 %v638_v23 }
 0x3b6   :  { %v659_v25 = vmul.f32 %v803_v24, %v657_v18  ;;  %vm664_vm11 = vweird.f32 %v803_v24 }
 0x3b7   :  { %v651_v42 = vor.u32 1.1754944e-38, %v650_v33  ;;  %vm649_vm10 = vcmp.eq.f32.partialorder %v648_v37, 8.507059e+37  ;;  %vm665_vm13 = vmor %vm663_vm12, %vm664_vm11 }
 0x3b8   :  { %v660_v29 = vsub.f32 1.0, %v659_v25 }
 0x3ba   :  { %v661_v38 = vmul.f32 %v803_v24, %v660_v29 }
 0x3bb   :  { %v805_v26 = vpop.eup %804 }
 0x3bc   :  { %v640_v28 = vmul.f32 %v805_v26, %v638_v23  ;;  %vm645_vm7 = vweird.f32 %v805_v26  ;;  %v662_v48 = vadd.f32 %v803_v24, %v661_v38 }
 0x3bd   :  { %vm646_vm9 = vmor %vm644_vm8, %vm645_vm7 }
 0x3be   :  { %v641_v31 = vsub.f32 1.0, %v640_v28  ;;  %v666_v54 = vsel %vm665_vm13, %v803_v24, %v662_v48 }
 0x3bf   :  { %v671_v56 = vsel %vm668_vm14, %v670_v55, %v666_v54 }
 0x3c0   :  { %v642_v36 = vmul.f32 %v805_v26, %v641_v31  ;;  %v676_v57 = vsub.f32 1.0, %v671_v56  ;;  %v678_v60 = vmul.f32 %v671_v56, %v1047_v46 }
 0x3c2   :  { %v643_v40 = vadd.f32 %v805_v26, %v642_v36 }
 0x3c4   :  { %v647_v45 = vsel %vm646_vm9, %v805_v26, %v643_v40 }
 0x3c5   :  { %v652_v47 = vsel %vm649_vm10, %v651_v42, %v647_v45 }
 0x3c6   :  { %v673_v49 = vmul.f32 %v652_v47, %v633_v44 }
 0x3c8   :  { %v674_v53 = vadd.f32 %v673_v49, %v593_v50 }
 0x3ca   :  { %806 = vtanh.f32 %v674_v53 }
 0x3d0   :  { %v807_v58 = vpop.eup %806 }
 0x3d1   :  { %v677_v59 = vmul.f32 %v807_v58, %v676_v57 }
 0x3d3   :  { %v679_v61 = vadd.f32 %v678_v60, %v677_v59 }
 0x3d5   :  { %680 = vst [vmem:[%s1203_s14] sm:$0x1] %v679_v61  ;;  %714 = vmatmul.f32.vlgmr.msrb.gmra.mxu2 %v679_v61  ;;  %s761_s14 = sshll.u32 %s947_s24, 4  ;;  %s762_s14 = int_to_ptr.vmem [resolvable:$true] %s761_s14 }
 0x3d6   :  { %766 = dma.vmem_to_hbm [thread:$0]  %s762_s14, 16, %s764_s25, [#allocation10]  }
 0x458   :  { %v715_v63 = vpop.f32.mrf.mxu2 }
 0x459   :  { %v716_v0 = vadd.f32 %v715_v63, %v697_v62 }
 0x45b   :  { %v718_v1 = vsel %vm201_vm2, %v716_v0, -inf }
 0x45c   :  { %719 = vmax.xlane.f32.xlu1 %v718_v1 }
 0x4cf   :  { %v720_v2 = vpop.xlane.xlu1 %719 }
 0x4d0   :  { %v721_v3 = vsub.f32 %v716_v0, %v720_v2 }
 0x4d2   :  { %v722_v4 = vmul.f32 1.442695, %v721_v3 }
 0x4d4   :  { %808 = vpow2.f32 %v722_v4 }
 0x4da   :  { %v809_v46 = vpop.eup %808 }
 0x4db   :  { %v724_v5 = vsel %vm201_vm2, %v809_v46, 0.0 }
 0x4dc   :  { %725 = vadd.xlane.f32.xlu1 %v724_v5 }
 0x54f   :  { %v726_v6 = vpop.xlane.xlu1 %725 }
 0x550   :  { %810 = vrcp.f32 %v726_v6  ;;  %v738_v10 = vand.u32 2147483648, %v726_v6  ;;  %v736_v12 = vand.u32 2147483647, %v726_v6  ;;  %vm732_vm0 = vweird.f32 %v726_v6 }
 0x552   :  { %v739_v14 = vor.u32 1.1754944e-38, %v738_v10  ;;  %vm737_vm2 = vcmp.eq.f32.partialorder %v736_v12, 8.507059e+37 }
 0x556   :  { %v811_v7 = vpop.eup %810 }
 0x557   :  { %v728_v8 = vmul.f32 %v811_v7, %v726_v6  ;;  %vm733_vm15 = vweird.f32 %v811_v7 }
 0x558   :  { %vm734_vm1 = vmor %vm732_vm0, %vm733_vm15 }
 0x559   :  { %v729_v9 = vsub.f32 1.0, %v728_v8 }
 0x55b   :  { %v730_v11 = vmul.f32 %v811_v7, %v729_v9 }
 0x55d   :  { %v731_v13 = vadd.f32 %v811_v7, %v730_v11 }
 0x55f   :  { %v735_v15 = vsel %vm734_vm1, %v811_v7, %v731_v13 }
 0x560   :  { %v740_v16 = vsel %vm737_vm2, %v739_v14, %v735_v15 }
 0x561   :  { %v741_v17 = vmul.f32 %v809_v46, %v740_v16 }
 0x563   :  { %742 = vst [vmem:[#allocation8] sm:$0x1] %v741_v17 }
 0x564   :  { %753 = dma.vmem_to_hbm [thread:$0]  %s749_s26, 16, %s751_s4, [#allocation4]  }
 0x565   :  { %936 = dma.done.wait [#allocation4], 16  }
 0x566   :  { %937 = vsyncadd [#allocation4], 4294967280 }
 0x567   :  { %938 = dma.done.wait [#allocation10], 16  }
 0x568   :  { %939 = vsyncadd [#allocation10], 4294967280 }
 0x569   :  { %777 = vsyncpa [#allocation3], 1 }
 0x56a   :  { %778 = vsyncpa [#allocation6], 1 }
 0x56b   :  { %779 = vsyncpa [#allocation4], 1 }
 0x56c   :  { %780 = vsyncpa [#allocation10], 1 }

</bundles_post_ra>
